<compile_context>
chip_gen: v7x
topology: tpu7x:2x2x1
jax: 0.10.0
libtpu: 0.0.40
codegen_flags: <defaults>
</compile_context>

<pallas_src>
import jax
import jax.numpy as jnp
from jax.experimental import pallas as pl
from jax.experimental.pallas import tpu as pltpu

EPSILON = float(jnp.finfo(jnp.float32).eps)   # matches torch.finfo(float32).eps


def _round_up(x, m):
    return ((x + m - 1) // m) * m


# --------------------------------------------------------------------------
# Glue: window / fused DFT-matrix construction, reflect padding, framing
# --------------------------------------------------------------------------
def _hann_window(win_len):
    # torch.hann_window(win_len) (periodic=True)
    n = jnp.arange(win_len, dtype=jnp.float32)
    return 0.5 - 0.5 * jnp.cos(2.0 * jnp.pi * n / win_len)


def _make_fused_dft(fft_len, win_len, f_pad):
    """(fft_len, 2*f_pad) bf16 RHS: [win*cos | -win*sin], freq zero-padded.

    NOTE: the padded frequency columns MUST stay exactly zero — the analytic
    EPSILON correction in stft_loss() relies on it.
    """
    window = _hann_window(win_len)
    left = (fft_len - win_len) // 2              # torch.stft centres the window
    win_p = jnp.pad(window, (left, fft_len - win_len - left))
    freq = fft_len // 2 + 1                      # onesided=True
    n = jnp.arange(fft_len, dtype=jnp.float32)[:, None]
    k = jnp.arange(freq, dtype=jnp.float32)[None, :]
    ang = 2.0 * jnp.pi * n * k / fft_len
    wcos = win_p[:, None] * jnp.cos(ang)
    wsin = -win_p[:, None] * jnp.sin(ang)
    pad = ((0, 0), (0, f_pad - freq))
    wcos = jnp.pad(wcos, pad)                    # padded cols are exactly zero
    wsin = jnp.pad(wsin, pad)
    # TODO(synk): on v5e, interleaving cos/sin per 128-lane block (padding to
    # round_up(2*n_freq, 128) instead of 2*round_up(n_freq, 128)) trims wasted
    # MXU N columns when n_freq is far from a multiple of 128.
    return jnp.concatenate([wcos, wsin], axis=1).astype(jnp.bfloat16)


def _frame(wav, fft_len, hop, n_out, dtype):
    """torch.stft(center=True, pad_mode='reflect') framing.

    Returns (B, n_out, fft_len) in `dtype`.  The cast to `dtype` happens BEFORE
    padding/slicing so every framing pass moves half-width (bf16) data, and the
    overlapping frames are built gather-free (hop-chunk slices + concat) when
    hop divides fft_len.
    """
    B, T = wav.shape
    pad = fft_len // 2
    x = jnp.pad(wav.astype(dtype), ((0, 0), (pad, pad)), mode="reflect")
    if fft_len % hop == 0:
        r = fft_len // hop
        need = (n_out + r - 1) * hop             # samples covering all n_out frames
        if need >= x.shape[1]:
            x = jnp.pad(x, ((0, 0), (0, need - x.shape[1])))
        else:
            x = x[:, :need]
        chunks = x.reshape(B, n_out + r - 1, hop)
        # Frame g, columns [s*hop:(s+1)*hop] == chunk g+s  (slices + concat,
        # no XLA gather).
        return jnp.concatenate([chunks[:, s:s + n_out, :] for s in range(r)],
                               axis=-1)
    # TODO(synk): hop not dividing fft_len falls back to an XLA gather (correct
    # but slow, dwarfs the kernel for long signals) — implement a strided-slice
    # path if this configuration is ever used.
    idx = jnp.arange(n_out)[:, None] * hop + jnp.arange(fft_len)[None, :]
    return jnp.take(x, idx, axis=1)


def _wdft_spec(fft_len, f_pad):
    """BlockSpec for the constant-index DFT RHS; single-buffered (its block
    index never changes) to halve its VMEM footprint on v7x's 64 MiB."""
    shape = (fft_len, 2 * f_pad)
    idx = lambda b, t: (0, 0)
    try:
        return pl.BlockSpec(shape, idx, pipeline_mode=pl.Buffered(1))
    except (TypeError, AttributeError):          # older jax: no pipeline_mode
        return pl.BlockSpec(shape, idx)


# --------------------------------------------------------------------------
# Pallas kernel: chunked bf16 STFT matmuls + loss partial sums per batch row
# --------------------------------------------------------------------------
def _make_kernel(nf_tile, chunk, f_pad):
    n_chunks = nf_tile // chunk

    def kernel(ref_ref, est_ref, wdft_ref, out_ref, acc_ref):
        t = pl.program_id(1)

        @pl.when(t == 0)
        def _():
            acc_ref[...] = jnp.zeros_like(acc_ref)

        def body(c, carry):
            a_sum, d_sum, r_sum = carry
            off = pl.multiple_of(c * chunk, chunk)
            # Two bf16 MXU matmuls with f32 accumulation per chunk.
            sp_r = jnp.dot(ref_ref[pl.ds(off, chunk), :], wdft_ref[...],
                           preferred_element_type=jnp.float32)
            sp_e = jnp.dot(est_ref[pl.ds(off, chunk), :], wdft_ref[...],
                           preferred_element_type=jnp.float32)
            re_r, im_r = sp_r[:, :f_pad], sp_r[:, f_pad:]   # lane-aligned splits
            re_e, im_e = sp_e[:, :f_pad], sp_e[:, f_pad:]
            p_r = jnp.maximum(re_r * re_r + im_r * im_r, EPSILON)
            p_e = jnp.maximum(re_e * re_e + im_e * im_e, EPSILON)

            # |log(ref_mag) - log(est_mag)| = 0.5*|log(p_r/p_e)|.
            # approx reciprocal runs on the EUP (otherwise idle slot); its
            # ~2^-12 error is far below the accepted bf16 input noise.
            ratio = p_r * pl.reciprocal(p_e, approx=True)
            a_sum = a_sum + 0.5 * jnp.sum(jnp.abs(jnp.log(ratio)), keepdims=True)

            d = jnp.sqrt(p_r) - jnp.sqrt(p_e)            # padded entries are 0
            d_sum = d_sum + jnp.sum(d * d, keepdims=True)

            # ||ref||_F^2 straight from the clamped power; padded rows/cols add
            # exactly EPSILON each — corrected analytically in the wrapper.
            r_sum = r_sum + jnp.sum(p_r, keepdims=True)
            return a_sum, d_sum, r_sum

        zero = jnp.zeros((1, 1), jnp.float32)
        a_sum, d_sum, r_sum = jax.lax.fori_loop(
            0, n_chunks, body, (zero, zero, zero), unroll=True)

        # Pack the three partial sums into lanes 0..2 of the (8, 128) row.
        lane = jax.lax.broadcasted_iota(jnp.int32, acc_ref.shape, 1)
        acc_ref[...] += (jnp.where(lane == 0, a_sum, 0.0)
                         + jnp.where(lane == 1, d_sum, 0.0)
                         + jnp.where(lane == 2, r_sum, 0.0))

        @pl.when(t == pl.num_programs(1) - 1)
        def _():
            out_ref[...] = acc_ref[...]                  # lane-dense (8,128) store

    return kernel


def stft_loss(ref_wav, est_wav, fft_len, win_inc, win_len, reduction="mean"):
    assert reduction in ("mean", "batch")
    B, T = ref_wav.shape
    n_frames = 1 + T // win_inc
    n_freq = fft_len // 2 + 1
    f_pad = _round_up(n_freq, 128)                 # lane-dense freq axis

    # Frame-tile selection.  v7x only has 64 MiB VMEM, so shrink the tile for
    # very large FFTs (wdft + double-buffered frame tiles + f32 epilogue);
    # v5e/v6e could keep 256 with a higher vmem limit, but 128 is safe on all.
    if n_frames >= 256:
        nf_tile = 128 if fft_len >= 2048 else 256
    else:
        nf_tile = _round_up(n_frames, 8)
        if nf_tile > 64:
            nf_tile = _round_up(nf_tile, 64)
    chunk = min(64, nf_tile)                       # epilogue M-chunk (vreg bound)
    assert nf_tile % chunk == 0
    nt = pl.cdiv(n_frames, nf_tile)
    nf_pad = nt * nf_tile

    wdft = _make_fused_dft(fft_len, win_len, f_pad)        # (fft, 2*f_pad) bf16

    def prep(wav):
        fr = _frame(wav, fft_len, win_inc, n_frames, jnp.bfloat16)
        if nf_pad != n_frames:
            # Padded frame rows must be exactly zero (see EPSILON correction).
            fr = jnp.pad(fr, ((0, 0), (0, nf_pad - n_frames), (0, 0)))
        return fr                                  # (B, nf_pad, fft_len) bf16

    ref_frames = prep(ref_wav)
    est_frames = prep(est_wav)

    flops = 2 * B * nt * (2 * nf_tile) * fft_len * (2 * f_pad)
    transcend = 4 * B * nf_pad * f_pad
    bytes_acc = (2 * B * nf_pad * fft_len) * 2 + fft_len * 2 * f_pad * 2 \
        + B * 8 * 128 * 4
    vmem_limit = (48 if fft_len >= 1024 else 32) * 1024 * 1024

    sums = pl.pallas_call(
        _make_kernel(nf_tile, chunk, f_pad),
        out_shape=jax.ShapeDtypeStruct((B, 8, 128), jnp.float32),
        grid_spec=pltpu.PrefetchScalarGridSpec(
            num_scalar_prefetch=0,
            grid=(B, nt),                           # frame (reduction) axis last
            in_specs=[
                pl.BlockSpec((None, nf_tile, fft_len), lambda b, t: (b, t, 0)),
                pl.BlockSpec((None, nf_tile, fft_len), lambda b, t: (b, t, 0)),
                _wdft_spec(fft_len, f_pad),
            ],
            out_specs=pl.BlockSpec((None, 8, 128), lambda b, t: (b, 0, 0)),
            scratch_shapes=[pltpu.VMEM((8, 128), jnp.float32)],
        ),
        compiler_params=pltpu.CompilerParams(
            dimension_semantics=("parallel", "arbitrary"),
            vmem_limit_bytes=vmem_limit,
        ),
        cost_estimate=pl.CostEstimate(flops=int(flops),
                                      transcendentals=int(transcend),
                                      bytes_accessed=int(bytes_acc)),
    )(ref_frames, est_frames, wdft)

    abs_sum = sums[:, 0, 0]
    diff_sq = sums[:, 0, 1]
    # Every padded frame row / freq column contributes exactly EPSILON to the
    # clamped reference power (zero bf16 frames x zero DFT columns, exact
    # clamp), so subtract the known padding contribution instead of masking
    # in-kernel.  This is exact as long as the padding stays exactly zero.
    pad_cells = nf_pad * f_pad - n_frames * n_freq
    ref_sq = sums[:, 0, 2] - EPSILON * pad_cells
    n_per_batch = n_frames * n_freq

    if reduction == "mean":
        loss_mag = jnp.sum(abs_sum) / (B * n_per_batch)
        loss_sc = jnp.sqrt(jnp.sum(diff_sq)) / jnp.sqrt(jnp.sum(ref_sq))
    else:  # 'batch'
        loss_mag = abs_sum / n_per_batch
        loss_sc = jnp.sqrt(diff_sq) / jnp.sqrt(ref_sq)
    return loss_mag, loss_sc


# --------------------------------------------------------------------------
# Pure-JAX f32 reference (same semantics as the torch module) for sanity check
# --------------------------------------------------------------------------
def _reference(ref_wav, est_wav, fft_len, win_inc, win_len, reduction="mean"):
    B, T = ref_wav.shape
    n_frames = 1 + T // win_inc
    window = _hann_window(win_len)
    left = (fft_len - win_len) // 2
    win_p = jnp.pad(window, (left, fft_len - win_len - left))

    def spec_mag(w):
        frames = _frame(w, fft_len, win_inc, n_frames, jnp.float32)
        frames = frames * win_p[None, None, :]
        spec = jnp.fft.rfft(frames, n=fft_len, axis=-1)      # (B, NF, F)
        return jnp.sqrt(jnp.maximum(spec.real ** 2 + spec.imag ** 2, EPSILON))

    ref_mag = spec_mag(ref_wav)
    est_mag = spec_mag(est_wav)
    if reduction == "mean":
        loss_mag = jnp.mean(jnp.abs(jnp.log(ref_mag) - jnp.log(est_mag)))
        loss_sc = (jnp.sqrt(jnp.sum((ref_mag - est_mag) ** 2))
                   / jnp.sqrt(jnp.sum(ref_mag ** 2)))
    else:
        loss_mag = jnp.mean(jnp.abs(jnp.log(ref_mag) - jnp.log(est_mag)), axis=(1, 2))
        loss_sc = (jnp.sqrt(jnp.sum((ref_mag - est_mag) ** 2, axis=(1, 2)))
                   / jnp.sqrt(jnp.sum(ref_mag ** 2, axis=(1, 2))))
    return loss_mag, loss_sc


if __name__ == "__main__":
    key = jax.random.PRNGKey(0)

    def check(B, T, fft_len, win_inc, win_len, reductions):
        k1, k2 = jax.random.split(jax.random.fold_in(key, fft_len))
        ref_wav = jax.random.normal(k1, (B, T), dtype=jnp.float32)
        est_wav = ref_wav + 0.1 * jax.random.normal(k2, (B, T), dtype=jnp.float32)
        for red in reductions:
            lm, ls = stft_loss(ref_wav, est_wav, fft_len, win_inc, win_len, red)
            jax.block_until_ready((lm, ls))
            rm, rs = _reference(ref_wav, est_wav, fft_len, win_inc, win_len, red)
            # Frames are bf16 on the MXU and the log-ratio uses an approx
            # reciprocal, so the log-L1 tolerance is looser than the (robust)
            # spectral-convergence tolerance.
            assert jnp.allclose(lm, rm, rtol=5e-2, atol=1e-2), (red, lm, rm)
            assert jnp.allclose(ls, rs, rtol=2e-2, atol=2e-3), (red, ls, rs)

    # fft_len=128, hop=64: NF = 1 + T//hop = 8 frames, F = 65 bins (one tile).
    check(2, 448, 128, 64, 128, reductions=("mean", "batch"))
    # fft_len=64, hop=16: NF = 101 frames -> exercises the in-kernel chunk loop
    # (n_chunks = 2) and the padded-frame EPSILON correction (nf_pad = 128).
    check(2, 1600, 64, 16, 64, reductions=("mean",))

    print("KERNEL_OK")
</pallas_src>

<mosaic_0001>
module attributes {stable_mosaic.version = 11 : i64} {
  func.func @kernel(%arg0: i32, %arg1: i32, %arg2: memref<1x8x128xbf16, #tpu.memory_space<vmem>>, %arg3: memref<1x8x128xbf16, #tpu.memory_space<vmem>>, %arg4: memref<128x256xbf16, #tpu.memory_space<vmem>>, %arg5: memref<1x8x128xf32, #tpu.memory_space<vmem>>, %arg6: memref<8x128xf32, #tpu.memory_space<vmem>>) attributes {dimension_semantics = [#tpu.dimension_semantics<parallel>, #tpu.dimension_semantics<arbitrary>], iteration_bounds = array<i64: 2, 1>, scalar_prefetch = 0 : i64, scratch_operands = 1 : i64, tpu.core_type = #tpu.core_type<tc>, window_params = [{transform_indices = @transform_0, window_bounds = array<i64: 1, 8, 128>}, {transform_indices = @transform_1, window_bounds = array<i64: 1, 8, 128>}, {pipeline_mode = #tpu.pipeline_mode<synchronous>, transform_indices = @transform_2, window_bounds = array<i64: 128, 256>}, {transform_indices = @transform_3, window_bounds = array<i64: 1, 8, 128>}]} {
    %c0_i32 = arith.constant 0 : i32
    %0 = arith.cmpi eq, %arg1, %c0_i32 : i32
    %1 = arith.extui %0 : i1 to i32
    %c0_i32_0 = arith.constant 0 : i32
    %2 = arith.cmpi ne, %1, %c0_i32_0 : i32
    scf.if %2 {
      %cst_28 = arith.constant 0.000000e+00 : f32
      %85 = vector.broadcast %cst_28 : f32 to vector<8x128xf32>
      %c0_29 = arith.constant 0 : index
      %c0_30 = arith.constant 0 : index
      %86 = vector.load %arg6[%c0_29, %c0_30] : memref<8x128xf32, #tpu.memory_space<vmem>>, vector<8x128xf32>
      tpu.vector_store %arg6[%c0_29, %c0_30], %85 {strides = array<i32>} : memref<8x128xf32, #tpu.memory_space<vmem>>, vector<8x128xf32>,
    } else {
    }
    %cst = arith.constant 0.000000e+00 : f32
    %3 = vector.broadcast %cst : f32 to vector<1x1xf32>
    %c0_i32_1 = arith.constant 0 : i32
    %c8_i32 = arith.constant 8 : i32
    %4 = arith.muli %c0_i32_1, %c8_i32 : i32
    %5 = tpu.assume_multiple %4, 8 : i32
    %c0 = arith.constant 0 : index
    %6 = arith.index_cast %5 : i32 to index
    %c0_2 = arith.constant 0 : index
    %7 = vector.load %arg2[%c0, %6, %c0_2] : memref<1x8x128xbf16, #tpu.memory_space<vmem>>, vector<1x8x128xbf16>
    %8 = vector.shape_cast %7 : vector<1x8x128xbf16> to vector<8x128xbf16>
    %c0_3 = arith.constant 0 : index
    %c0_4 = arith.constant 0 : index
    %9 = vector.load %arg4[%c0_3, %c0_4] : memref<128x256xbf16, #tpu.memory_space<vmem>>, vector<128x256xbf16>
    %cst_5 = arith.constant dense<0.000000e+00> : vector<8x256xf32>
    %10 = tpu.matmul %8, %9, %cst_5 {dimension_numbers = #tpu.dot_dimension_numbers<[1], [0], [0], [1], [0, 0, 1, 1], [], []>} : vector<8x128xbf16>, vector<128x256xbf16>, vector<8x256xf32> -> vector<8x256xf32>
    %c0_6 = arith.constant 0 : index
    %11 = arith.index_cast %5 : i32 to index
    %c0_7 = arith.constant 0 : index
    %12 = vector.load %arg3[%c0_6, %11, %c0_7] : memref<1x8x128xbf16, #tpu.memory_space<vmem>>, vector<1x8x128xbf16>
    %13 = vector.shape_cast %12 : vector<1x8x128xbf16> to vector<8x128xbf16>
    %c0_8 = arith.constant 0 : index
    %c0_9 = arith.constant 0 : index
    %14 = vector.load %arg4[%c0_8, %c0_9] : memref<128x256xbf16, #tpu.memory_space<vmem>>, vector<128x256xbf16>
    %cst_10 = arith.constant dense<0.000000e+00> : vector<8x256xf32>
    %15 = tpu.matmul %13, %14, %cst_10 {dimension_numbers = #tpu.dot_dimension_numbers<[1], [0], [0], [1], [0, 0, 1, 1], [], []>} : vector<8x128xbf16>, vector<128x256xbf16>, vector<8x256xf32> -> vector<8x256xf32>
    %16 = vector.extract_strided_slice %10 {offsets = [0, 0], sizes = [8, 128], strides = [1, 1]} : vector<8x256xf32> to vector<8x128xf32>
    %17 = vector.extract_strided_slice %10 {offsets = [0, 128], sizes = [8, 128], strides = [1, 1]} : vector<8x256xf32> to vector<8x128xf32>
    %18 = vector.extract_strided_slice %15 {offsets = [0, 0], sizes = [8, 128], strides = [1, 1]} : vector<8x256xf32> to vector<8x128xf32>
    %19 = vector.extract_strided_slice %15 {offsets = [0, 128], sizes = [8, 128], strides = [1, 1]} : vector<8x256xf32> to vector<8x128xf32>
    %20 = arith.mulf %16, %16 : vector<8x128xf32>
    %21 = arith.mulf %17, %17 : vector<8x128xf32>
    %22 = arith.addf %20, %21 : vector<8x128xf32>
    %cst_11 = arith.constant 1.1920929E-7 : f32
    %23 = vector.broadcast %cst_11 : f32 to vector<8x128xf32>
    %24 = arith.maximumf %22, %23 : vector<8x128xf32>
    %25 = arith.mulf %18, %18 : vector<8x128xf32>
    %26 = arith.mulf %19, %19 : vector<8x128xf32>
    %27 = arith.addf %25, %26 : vector<8x128xf32>
    %cst_12 = arith.constant 1.1920929E-7 : f32
    %28 = vector.broadcast %cst_12 : f32 to vector<8x128xf32>
    %29 = arith.maximumf %27, %28 : vector<8x128xf32>
    %30 = tpu.reciprocal %29 {approx = true} : vector<8x128xf32> -> vector<8x128xf32>
    %31 = arith.mulf %24, %30 : vector<8x128xf32>
    %32 = math.log %31 : vector<8x128xf32>
    %33 = math.absf %32 : vector<8x128xf32>
    %34 = vector.shape_cast %33 : vector<8x128xf32> to vector<1x8x128xf32>
    %cst_13 = arith.constant dense<0.000000e+00> : vector<1xf32>
    %35 = vector.multi_reduction <add>, %34, %cst_13 [1, 2] : vector<1x8x128xf32> to vector<1xf32>
    %36 = vector.shape_cast %35 : vector<1xf32> to vector<1x1x1xf32>
    %37 = vector.extract %36[0, 0, 0] : f32 from vector<1x1x1xf32>
    %38 = vector.broadcast %37 : f32 to vector<1x1xf32>
    %cst_14 = arith.constant 5.000000e-01 : f32
    %39 = vector.broadcast %cst_14 : f32 to vector<1x1xf32>
    %40 = arith.mulf %39, %38 : vector<1x1xf32>
    %41 = arith.addf %3, %40 : vector<1x1xf32>
    %42 = math.sqrt %24 : vector<8x128xf32>
    %43 = math.sqrt %29 : vector<8x128xf32>
    %44 = arith.subf %42, %43 : vector<8x128xf32>
    %45 = arith.mulf %44, %44 : vector<8x128xf32>
    %46 = vector.shape_cast %45 : vector<8x128xf32> to vector<1x8x128xf32>
    %cst_15 = arith.constant dense<0.000000e+00> : vector<1xf32>
    %47 = vector.multi_reduction <add>, %46, %cst_15 [1, 2] : vector<1x8x128xf32> to vector<1xf32>
    %48 = vector.shape_cast %47 : vector<1xf32> to vector<1x1x1xf32>
    %49 = vector.extract %48[0, 0, 0] : f32 from vector<1x1x1xf32>
    %50 = vector.broadcast %49 : f32 to vector<1x1xf32>
    %51 = arith.addf %3, %50 : vector<1x1xf32>
    %52 = vector.shape_cast %24 : vector<8x128xf32> to vector<1x8x128xf32>
    %cst_16 = arith.constant dense<0.000000e+00> : vector<1xf32>
    %53 = vector.multi_reduction <add>, %52, %cst_16 [1, 2] : vector<1x8x128xf32> to vector<1xf32>
    %54 = vector.shape_cast %53 : vector<1xf32> to vector<1x1x1xf32>
    %55 = vector.extract %54[0, 0, 0] : f32 from vector<1x1x1xf32>
    %56 = vector.broadcast %55 : f32 to vector<1x1xf32>
    %57 = arith.addf %3, %56 : vector<1x1xf32>
    %c1_i32 = arith.constant 1 : i32
    %58 = tpu.iota {dimensions = array<i32: 1>} : vector<8x128xi32>
    %c0_17 = arith.constant 0 : index
    %c0_18 = arith.constant 0 : index
    %59 = vector.load %arg6[%c0_17, %c0_18] : memref<8x128xf32, #tpu.memory_space<vmem>>, vector<8x128xf32>
    %c0_i32_19 = arith.constant 0 : i32
    %60 = vector.broadcast %c0_i32_19 : i32 to vector<8x128xi32>
    %61 = arith.cmpi eq, %58, %60 : vector<8x128xi32>
    %cst_20 = arith.constant 0.000000e+00 : f32
    %62 = vector.shape_cast %41 : vector<1x1xf32> to vector<1x1xf32>
    %63 = vector.broadcast %62 : vector<1x1xf32> to vector<8x128xf32>
    %64 = vector.broadcast %cst_20 : f32 to vector<8x128xf32>
    %65 = arith.select %61, %63, %64 : vector<8x128xi1>, vector<8x128xf32>
    %c1_i32_21 = arith.constant 1 : i32
    %66 = vector.broadcast %c1_i32_21 : i32 to vector<8x128xi32>
    %67 = arith.cmpi eq, %58, %66 : vector<8x128xi32>
    %cst_22 = arith.constant 0.000000e+00 : f32
    %68 = vector.shape_cast %51 : vector<1x1xf32> to vector<1x1xf32>
    %69 = vector.broadcast %68 : vector<1x1xf32> to vector<8x128xf32>
    %70 = vector.broadcast %cst_22 : f32 to vector<8x128xf32>
    %71 = arith.select %67, %69, %70 : vector<8x128xi1>, vector<8x128xf32>
    %72 = arith.addf %65, %71 : vector<8x128xf32>
    %c2_i32 = arith.constant 2 : i32
    %73 = vector.broadcast %c2_i32 : i32 to vector<8x128xi32>
    %74 = arith.cmpi eq, %58, %73 : vector<8x128xi32>
    %cst_23 = arith.constant 0.000000e+00 : f32
    %75 = vector.shape_cast %57 : vector<1x1xf32> to vector<1x1xf32>
    %76 = vector.broadcast %75 : vector<1x1xf32> to vector<8x128xf32>
    %77 = vector.broadcast %cst_23 : f32 to vector<8x128xf32>
    %78 = arith.select %74, %76, %77 : vector<8x128xi1>, vector<8x128xf32>
    %79 = arith.addf %72, %78 : vector<8x128xf32>
    %80 = arith.addf %59, %79 : vector<8x128xf32>
    %c0_24 = arith.constant 0 : index
    %c0_25 = arith.constant 0 : index
    %81 = vector.load %arg6[%c0_24, %c0_25] : memref<8x128xf32, #tpu.memory_space<vmem>>, vector<8x128xf32>
    tpu.vector_store %arg6[%c0_24, %c0_25], %80 {strides = array<i32>} : memref<8x128xf32, #tpu.memory_space<vmem>>, vector<8x128xf32>,
    %c0_i32_26 = arith.constant 0 : i32
    %82 = arith.cmpi eq, %arg1, %c0_i32_26 : i32
    %83 = arith.extui %82 : i1 to i32
    %c0_i32_27 = arith.constant 0 : i32
    %84 = arith.cmpi ne, %83, %c0_i32_27 : i32
    scf.if %84 {
      %c0_28 = arith.constant 0 : index
      %c0_29 = arith.constant 0 : index
      %85 = vector.load %arg6[%c0_28, %c0_29] : memref<8x128xf32, #tpu.memory_space<vmem>>, vector<8x128xf32>
      %c0_30 = arith.constant 0 : index
      %c0_31 = arith.constant 0 : index
      %c0_32 = arith.constant 0 : index
      %86 = vector.load %arg5[%c0_30, %c0_31, %c0_32] : memref<1x8x128xf32, #tpu.memory_space<vmem>>, vector<1x8x128xf32>
      %87 = vector.shape_cast %86 : vector<1x8x128xf32> to vector<8x128xf32>
      %88 = vector.shape_cast %85 : vector<8x128xf32> to vector<1x8x128xf32>
      tpu.vector_store %arg5[%c0_30, %c0_31, %c0_32], %88 {strides = array<i32>} : memref<1x8x128xf32, #tpu.memory_space<vmem>>, vector<1x8x128xf32>,
    } else {
    }
    return
  }
  func.func @transform_0(%arg0: i32, %arg1: i32) -> (i32, i32, i32) {
    %c0_i32 = arith.constant 0 : i32
    %c0_i32_0 = arith.constant 0 : i32
    return %arg0, %arg1, %c0_i32 : i32, i32, i32
  }
  func.func @transform_1(%arg0: i32, %arg1: i32) -> (i32, i32, i32) {
    %c0_i32 = arith.constant 0 : i32
    %c0_i32_0 = arith.constant 0 : i32
    return %arg0, %arg1, %c0_i32 : i32, i32, i32
  }
  func.func @transform_2(%arg0: i32, %arg1: i32) -> (i32, i32) {
    %c0_i32 = arith.constant 0 : i32
    %c0_i32_0 = arith.constant 0 : i32
    %c0_i32_1 = arith.constant 0 : i32
    return %c0_i32, %c0_i32_0 : i32, i32
  }
  func.func @transform_3(%arg0: i32, %arg1: i32) -> (i32, i32, i32) {
    %c0_i32 = arith.constant 0 : i32
    %c0_i32_0 = arith.constant 0 : i32
    %c0_i32_1 = arith.constant 0 : i32
    return %arg0, %c0_i32, %c0_i32_0 : i32, i32, i32
  }
}

</mosaic_0001>

<bundles_post_ra>
// kernel: tpu_custom_call.1
= control target key start
LH: loop header
LB: loop body
LE: loop exit
PB: predicated region body
PF: predicated region fallthrough
CT: control target
= control target key end

     0   :  { %s1261_s0 = inlined_call_operand.hbm [shape: bf16[2,8,128], index: 0, kind: input, shape index: {}]   ;;  %s1262_s1 = inlined_call_operand.hbm [shape: bf16[2,8,128], index: 1, kind: input, shape index: {}]   ;;  %s1263_s2 = inlined_call_operand.hbm [shape: bf16[128,256], index: 2, kind: input, shape index: {}]   ;;  %s1264_s3 = inlined_call_operand.hbm [shape: f32[2,8,128], index: 3, kind: output, shape index: {}]  }
   0x1   :  { %1270 = sst [smem:[#allocation15_spill]] %s1263_s2 }
   0x2   :  { %8 = vsyncpa [#allocation4], 0 }
   0x3   :  { %10 = vsyncpa [#allocation4 + $0x1], 0 }
   0x4   :  { %11 = vsyncpa [#allocation7], 0 }
   0x5   :  { %13 = vsyncpa [#allocation7 + $0x1], 0 }
   0x6   :  { %14 = vsyncpa [#allocation5], 0 }
   0x7   :  { %16 = vsyncpa [#allocation5 + $0x1], 0  ;;  %s1008_s12 = smov 0   ;;  %s1010_s13 = smov 0  }
   0x8   :  { %s1012_s14 = smov 0   ;;  %s1014_s15 = smov 0  }
   0x9   :  { %s1016_s16 = smov 0   ;;  %s1018_s17 = smov 0  }
   0xa LB: > { %s1039_s18 = sadd.s32 4294967295, %s979_s17   ;;  %s649_s19 = sadd.s32 4294967294, %s979_s17   ;;  %s979_s17 = sphi %s1018_s17, %s22_s17   ;;  %s975_s16 = sphi %s1016_s16, %s1293_s16   ;;  %s971_s15 = sphi %s1014_s15, %s1292_s15   ;;  %s967_s14 = sphi %s1012_s14, %s1291_s14   ;;  %s963_s13 = sphi %s1010_s13, %s1290_s13   ;;  %s959_s12 = sphi %s1008_s12, %s1289_s12  }
   0xb   : > { %p56_p0 = scmp.ne.s32.totalorder %s963_s13, %s959_s12  ;;  %p1265_p1 = scmp.eq.s32.totalorder %s1039_s18, 0 }
   0xc   : > { %p135_p3 = scmp.eq.s32.totalorder %s649_s19, 1  ;;  %p650_p5 = scmp.ge.s32.totalorder %s979_s17, 1 }
   0xd   : > { %p1048_p4 = por %p1265_p1, %p56_p0  ;;  %p142_p7 = scmp.lt.s32.totalorder %s979_s17, 3 }
   0xe   : > { %p1053_p6 = por %p135_p3, %p56_p0  ;;  %s981_s23 = smov [#allocation8]  }
   0xf   : > { %s1271_s20 = scalar_select %p1048_p4, 1, 0 }
  0x10   : > { %s1272_s21 = scalar_select %p1053_p6, 1, 0 }
  0x11   : > { %p1058_p8 = pnand %p650_p5, %p142_p7  ;;  %s154_s24 = sshll.u32 %s981_s23, 4  ;;  %s155_s24 = int_to_ptr.vmem [resolvable:$true] %s154_s24 }
  0x12   : > { %s34_s26 = sadd.s32 1, %s975_s16  ;;  %s1275_s2 = sld [smem:[#allocation15_spill]] }
  0x13   : > { %s1273_s22 = scalar_select %p1058_p8, 1, 0 }
  0x14   : > { %p698_p9 = pneg %p1058_p8 }
  0x16   : > { %p1067_p11 = pnand %p698_p9, %p1265_p1 }
  0x18   : > { %s801_s29 = scalar_lea.hbm %s1275_s2, 2048  ;;  %p803_p13 = pneg %p1067_p11 }
  0x19   : > { %p802_p12 = scmp.ne.s32.totalorder %s1275_s2, %s801_s29  ;;  %p808_p5 = scmp.lt.u32.totalorder %s801_s29, %s1275_s2 }
  0x1b   : > { %p804_p0 = pnand %p803_p13, %p802_p12 }
  0x1d   : > { %p805_p3 = pneg %p804_p0 }
  0x1f   : > { %p810_p7 = pnand %p808_p5, %p805_p3 }
  0x21   : > { %813 = shalt.err (!%p810_p7)
}
  0x22   : > { %s814_s7 = scalar_lea.vmem %s155_s24, 2048  ;;  %p822_p2 = scmp.lt.s32.totalorder %s155_s24, %s155_s24 }
  0x23   : > { %p815_p9 = scmp.ne.s32.totalorder %s155_s24, %s814_s7  ;;  %p823_p6 = scmp.lt.s32.totalorder %s814_s7, %s814_s7 }
  0x25   : > { %p817_p10 = pnand %p815_p9, %p803_p13  ;;  %p824_p4 = por %p823_p6, %p822_p2 }
  0x27   : > { %p818_p1 = pneg %p817_p10 }
  0x29   : > { %p825_p8 = pnand %p824_p4, %p818_p1 }
  0x2b   : > { %828 = shalt.err (!%p825_p8)
}
  0x2c   : > { %s982_s8 = smov 128   ;;  %s983_s9 = smov 8  }
  0x2d   : > { %701 = dma.hbm_to_vmem [thread:$0]  (!%p1067_p11), %s1275_s2, 2048, %s155_s24, [#allocation7], %s982_s8, %s982_s8, %s983_s9  }
  0x2e   : > { %p36_p1 = scmp.ge.s32.totalorder %s34_s26, 2  ;;  %s43_s19 = sadd.s32 1, %s967_s14 }
  0x2f   : > { %p50_p2 = scmp.ne.s32.totalorder %s967_s14, %s963_s13  ;;  %p51_p4 = scmp.eq.s32.totalorder %s979_s17, 0 }
  0x30   : > { %s1295_s26 = smov (%p36_p1, %s34_s26), 0  ;;  %p1278_p8 = scmp.eq.s32.totalorder %s1039_s18, 1 }
  0x31   : > { %1276 = sst [smem:[#allocation14_spill]] %s1295_s26  ;;  %p1094_p6 = por %p51_p4, %p50_p2 }
  0x32   : > { %p1100_p10 = por %p1278_p8, %p50_p2  ;;  %s38_s27 = ssub.s32 %s975_s16, %s1295_s26 }
  0x33   : > { %p714_p11 = scmp.lt.s32.totalorder %s979_s17, 2  ;;  %p41_p12 = scmp.eq.s32.totalorder %s38_s27, 0 }
  0x34   : > { %s1279_s25 = scalar_select %p1100_p10, 1, 0 }
  0x35   : > { %s168_s24 = sand.u32 1, %s967_s14   ;;  %s654_s30 = sshll.u32 %s975_s16, 6 }
  0x36   : > { %s1108_s28 = sshll.u32 %s168_s24, 2  ;;  %s1117_s6 = scalar_lea.hbm %s1261_s0, %s654_s30 }
  0x37   : > { %s1111_s29 = scalar_select %p41_p12, %s967_s14, %s43_s19  }
  0x38   : > { %s172_s7 = scalar_lea.vmem [#allocation3], %s1108_s28  ;;  %p1124_p13 = pnand %p714_p11, %p1094_p6 }
  0x39   : > { %s180_s8 = sshll.u32 %s172_s7, 4  ;;  %s1131_s19 = scalar_lea.hbm %s1262_s1, %s654_s30  ;;  %s1120_s8 = int_to_ptr.vmem [resolvable:$true] %s180_s8 }
  0x3a   : > { %s187_s27 = sand.u32 1, %s979_s17   ;;  %s169_s4 = scalar_lea.sflag [#allocation4], %s168_s24 }
  0x3b   : > { %s829_s5 = scalar_lea.hbm %s1117_s6, 64  ;;  %p831_p3 = pneg %p1124_p13 }
  0x3c   : > { %p830_p0 = scmp.ne.s32.totalorder %s1117_s6, %s829_s5  ;;  %s834_s2 = scalar_lea.hbm %s1261_s0, 128 }
  0x3d   : > { %p835_p9 = scmp.lt.u32.totalorder %s1117_s6, %s1261_s0  ;;  %p836_p1 = scmp.lt.u32.totalorder %s834_s2, %s829_s5 }
  0x3e   : > { %p832_p5 = pnand %p831_p3, %p830_p0  ;;  %p838_p4 = scmp.lt.u32.totalorder %s829_s5, %s1117_s6 }
  0x3f   : > { %p837_p2 = por %p836_p1, %p835_p9 }
  0x40   : > { %p833_p7 = pneg %p832_p5 }
  0x41   : > { %p839_p6 = por %p838_p4, %p837_p2 }
  0x43   : > { %p840_p8 = pnand %p839_p6, %p833_p7 }
  0x45   : > { %843 = shalt.err (!%p840_p8)
}
  0x46   : > { %s844_s24 = scalar_lea.vmem %s1120_s8, 64  ;;  %s984_s30 = smov [#allocation3]  }
  0x47   : > { %p845_p11 = scmp.ne.s32.totalorder %s1120_s8, %s844_s24  ;;  %s849_s11 = sshll.u32 %s984_s30, 4  ;;  %s850_s11 = int_to_ptr.vmem [resolvable:$false] %s849_s11 }
  0x48   : > { %s851_s26 = scalar_lea.vmem %s850_s11, 128  ;;  %p852_p5 = scmp.lt.s32.totalorder %s1120_s8, %s850_s11 }
  0x49   : > { %p847_p12 = pnand %p845_p11, %p831_p3  ;;  %p853_p9 = scmp.lt.s32.totalorder %s851_s26, %s844_s24 }
  0x4b   : > { %p848_p0 = pneg %p847_p12  ;;  %p854_p1 = por %p853_p9, %p852_p5 }
  0x4d   : > { %p855_p2 = pnand %p854_p1, %p848_p0 }
  0x4f   : > { %858 = shalt.err (!%p855_p2)
}
  0x50   : > { %705 = dma.hbm_to_vmem [thread:$0]  (!%p1124_p13), %s1117_s6, 64, %s1120_s8, %s169_s4  }
  0x51   : > { %s191_s2 = scalar_lea.vmem [#allocation6], %s1108_s28  ;;  %s188_s23 = scalar_lea.sflag [#allocation7], %s187_s27 }
  0x52   : > { %s199_s5 = sshll.u32 %s191_s2, 4  ;;  %s859_s7 = scalar_lea.hbm %s1131_s19, 64  ;;  %s200_s5 = int_to_ptr.vmem [resolvable:$true] %s199_s5 }
  0x53   : > { %p860_p7 = scmp.ne.s32.totalorder %s1131_s19, %s859_s7  ;;  %s864_s30 = scalar_lea.hbm %s1262_s1, 128 }
  0x54   : > { %p865_p8 = scmp.lt.u32.totalorder %s1131_s19, %s1262_s1  ;;  %p866_p11 = scmp.lt.u32.totalorder %s864_s30, %s859_s7 }
  0x55   : > { %p862_p4 = pnand %p860_p7, %p831_p3  ;;  %p868_p0 = scmp.lt.u32.totalorder %s859_s7, %s1131_s19 }
  0x56   : > { %p867_p12 = por %p866_p11, %p865_p8 }
  0x57   : > { %p863_p6 = pneg %p862_p4 }
  0x58   : > { %p869_p5 = por %p868_p0, %p867_p12 }
  0x5a   : > { %p870_p9 = pnand %p869_p5, %p863_p6 }
  0x5c   : > { %873 = shalt.err (!%p870_p9)
}
  0x5d   : > { %s874_s28 = scalar_lea.vmem %s200_s5, 64  ;;  %s985_s6 = smov [#allocation6]  }
  0x5e   : > { %p875_p1 = scmp.ne.s32.totalorder %s200_s5, %s874_s28  ;;  %s879_s8 = sshll.u32 %s985_s6, 4  ;;  %s880_s8 = int_to_ptr.vmem [resolvable:$false] %s879_s8 }
  0x5f   : > { %s881_s27 = scalar_lea.vmem %s880_s8, 128  ;;  %p882_p4 = scmp.lt.s32.totalorder %s200_s5, %s880_s8 }
  0x60   : > { %p877_p2 = pnand %p875_p1, %p831_p3  ;;  %p883_p10 = scmp.lt.s32.totalorder %s881_s27, %s874_s28 }
  0x62   : > { %p878_p7 = pneg %p877_p2  ;;  %p884_p8 = por %p883_p10, %p882_p4 }
  0x64   : > { %p885_p11 = pnand %p884_p8, %p878_p7 }
  0x66   : > { %888 = shalt.err (!%p885_p11)
}
  0x67   : > { %708 = dma.hbm_to_vmem [thread:$0]  (!%p1124_p13), %s1131_s19, 64, %s200_s5, %s188_s23  }
  0x68   : > { %p1281_p6 = scmp.ne.s32.totalorder %s1273_s22, 0 }
  0x69   : > { %s1184_s4 = sand.u32 (!%p1281_p6), 1, %s963_s13   ;;  %p1282_p10 = scmp.ne.s32.totalorder (!%p1281_p6), %s1271_s20, 0 }
  0x6a   : > { %208 = sbr.rel (%p1281_p6) target bundleno = 629 (0x275), region = 32  ;;  %s658_s2 = sshll.u32 (!%p1281_p6), %s1184_s4, 2 }
  0x6b   : > { %s211_s7 = scalar_lea.sflag (!%p1281_p6), [#allocation4], %s1184_s4  ;;  %s1188_s10 = scalar_lea.vmem (!%p1281_p6), [#allocation3], %s658_s2 }
  0x71   : > { %942 = dma.done.wait (%p1282_p10), %s211_s7, 64  }
  0x72   : > { %944 = vsyncadd (%p1282_p10), %s211_s7, 4294967232  ;;  %s219_s9 = sand.u32 1, %s1039_s18   ;;  %s1195_s19 = scalar_lea.vmem [#allocation6], %s658_s2 }
  0x73   : > { %s220_s22 = scalar_lea.sflag [#allocation7], %s219_s9 }
  0x74   : > { %946 = dma.done.wait (%p1282_p10), %s220_s22, 64  }
  0x75   : > { %948 = vsyncadd (%p1282_p10), %s220_s22, 4294967232  ;;  %p1283_p13 = scmp.eq.s32.totalorder %s1039_s18, 0 }
  0x77   : > { %950 = dma.done.wait (%p1283_p13), [#allocation7], 2048   ;;  %p1284_p3 = pmov %p1283_p13 }
  0x78   : > { %v986_v0 = vmov 0   ;;  %v769_v1 = vld [vmem:[#allocation8 + $0x4] ss:$8 sps:$4 sm:$0xff]   ;;  %v771_v2 = vld [vmem:[#allocation8] ss:$8 sps:$4 sm:$0xff]   ;;  %s661_s20 = sshll.u32 %s1184_s4, 3 }
  0x79   : > { %952 = vsyncadd (%p1284_p3), [#allocation7], 4294965248  ;;  %390 = vmatprep.mubr.bf16.mxu0 %v986_v0  ;;  %432 = vmatprep.mubr.bf16.mxu1 %v986_v0  ;;  %v772_v3 = vld [vmem:[#allocation8 + $0x14] ss:$8 sps:$4 sm:$0xff]   ;;  %v774_v4 = vld [vmem:[#allocation8 + $0x10] ss:$8 sps:$4 sm:$0xff]  }
  0x7a   : > { %358 = vmatprep.subr.bf16.mxu0 %v769_v1  ;;  %400 = vmatprep.subr.bf16.mxu1 %v769_v1  ;;  %v775_v5 = vld [vmem:[#allocation8 + $0x24] ss:$8 sps:$4 sm:$0xff]   ;;  %v777_v6 = vld [vmem:[#allocation8 + $0x20] ss:$8 sps:$4 sm:$0xff]   ;;  %v778_v7 = vld [vmem:[#allocation8 + $0x34] ss:$8 sps:$4 sm:$0xff]  }
  0x7b   : > { %359 = vmatpush1.bf16.msra.mxu0 %v771_v2  ;;  %401 = vmatpush1.bf16.msra.mxu1 %v771_v2  ;;  %v780_v8 = vld [vmem:[#allocation8 + $0x30] ss:$8 sps:$4 sm:$0xff]   ;;  %v781_v9 = vld [vmem:[#allocation8 + $0x44] ss:$8 sps:$4 sm:$0xff]   ;;  %v783_v10 = vld [vmem:[#allocation8 + $0x40] ss:$8 sps:$4 sm:$0xff]  }
  0x7c   : > { %360 = vmatprep.subr.bf16.mxu0 %v772_v3  ;;  %402 = vmatprep.subr.bf16.mxu1 %v772_v3  ;;  %v784_v11 = vld [vmem:[#allocation8 + $0x54] ss:$8 sps:$4 sm:$0xff]   ;;  %v786_v12 = vld [vmem:[#allocation8 + $0x50] ss:$8 sps:$4 sm:$0xff]   ;;  %v787_v13 = vld [vmem:[#allocation8 + $0x64] ss:$8 sps:$4 sm:$0xff]  }
  0x7d   : > { %v789_v14 = vld [vmem:[#allocation8 + $0x60] ss:$8 sps:$4 sm:$0xff]   ;;  %v790_v15 = vld [vmem:[#allocation8 + $0x74] ss:$8 sps:$4 sm:$0xff]   ;;  %v792_v16 = vld [vmem:[#allocation8 + $0x70] ss:$8 sps:$4 sm:$0xff]  }
  0x7e   : > { %v261_v17 = vld [vmem:[%s1188_s10] sm:$0xf]  ;;  %v399_v18 = vld [vmem:[%s1195_s19] sm:$0xf]  ;;  %s679_s24 = sshll.u32 %s971_s15, 7  ;;  %s254_s30 = scalar_lea.vmem [#allocation9], %s661_s20 }
  0x7f   : > { %361 = vmatpush1.bf16.msra.mxu0 %v774_v4  ;;  %403 = vmatpush1.bf16.msra.mxu1 %v774_v4  ;;  %s536_s11 = sshll.u32 %s254_s30, 4  ;;  %s1212_s6 = scalar_lea.hbm %s1264_s3, %s679_s24  ;;  %s1214_s11 = int_to_ptr.vmem [resolvable:$true] %s536_s11 }
  0x80   : > { %362 = vmatprep.subr.bf16.mxu0 %v775_v5  ;;  %404 = vmatprep.subr.bf16.mxu1 %v775_v5  ;;  %s523_s8 = scalar_lea.sflag [#allocation5], %s1184_s4  ;;  %s889_s27 = scalar_lea.vmem %s1214_s11, 128 }
  0x81   : > { %p890_p12 = scmp.ne.s32.totalorder %s1214_s11, %s889_s27  ;;  %p1285_p0 = scmp.ne.s32.totalorder %s1279_s25, 0 }
  0x82   : > { %s987_s15 = smov [#allocation9]  }
  0x83   : > { %363 = vmatpush1.bf16.msra.mxu0 %v777_v6  ;;  %405 = vmatpush1.bf16.msra.mxu1 %v777_v6  ;;  %p891_p5 = pnand %p890_p12, %p1285_p0  ;;  %s893_s2 = sshll.u32 %s987_s15, 4  ;;  %s894_s2 = int_to_ptr.vmem [resolvable:$false] %s893_s2 }
  0x84   : > { %364 = vmatprep.subr.bf16.mxu0 %v778_v7  ;;  %406 = vmatprep.subr.bf16.mxu1 %v778_v7  ;;  %s895_s7 = scalar_lea.vmem %s894_s2, 256  ;;  %p896_p1 = scmp.lt.s32.totalorder %s1214_s11, %s894_s2 }
  0x85   : > { %p892_p9 = pneg %p891_p5  ;;  %p897_p2 = scmp.lt.s32.totalorder %s895_s7, %s889_s27 }
  0x87   : > { %365 = vmatpush1.bf16.msra.mxu0 %v780_v8  ;;  %407 = vmatpush1.bf16.msra.mxu1 %v780_v8  ;;  %p898_p7 = por %p897_p2, %p896_p1 }
  0x88   : > { %366 = vmatprep.subr.bf16.mxu0 %v781_v9  ;;  %408 = vmatprep.subr.bf16.mxu1 %v781_v9  ;;  %v504_v9 = vlaneseq }
  0x89   : > { %p899_p4 = pnand %p898_p7, %p892_p9 }
  0x8b   : > { %367 = vmatpush1.bf16.msra.mxu0 %v783_v10  ;;  %409 = vmatpush1.bf16.msra.mxu1 %v783_v10  ;;  %v505_v10 = vand.u32 127, %v504_v9 }
  0x8c   : > { %368 = vmatprep.subr.bf16.mxu0 %v784_v11  ;;  %410 = vmatprep.subr.bf16.mxu1 %v784_v11 }
  0x8d   : > { %vm507_vm4 = vcmp.eq.s32.totalorder %v505_v10, 0  ;;  %vm509_vm5 = vcmp.eq.s32.totalorder %v505_v10, 1  ;;  %vm512_vm6 = vcmp.eq.s32.totalorder %v505_v10, 2 }
  0x8f   : > { %369 = vmatpush1.bf16.msra.mxu0 %v786_v12  ;;  %411 = vmatpush1.bf16.msra.mxu1 %v786_v12 }
  0x90   : > { %370 = vmatprep.subr.bf16.mxu0 %v787_v13  ;;  %412 = vmatprep.subr.bf16.mxu1 %v787_v13 }
  0x93   : > { %371 = vmatpush1.bf16.msra.mxu0 %v789_v14  ;;  %413 = vmatpush1.bf16.msra.mxu1 %v789_v14 }
  0x94   : > { %372 = vmatprep.subr.bf16.mxu0 %v790_v15  ;;  %414 = vmatprep.subr.bf16.mxu1 %v790_v15 }
  0x97   : > { %373 = vmatpush1.bf16.msra.mxu0 %v792_v16  ;;  %415 = vmatpush1.bf16.msra.mxu1 %v792_v16 }
  0x9a   : > { %391 = vmatmul.mubr.bf16.vlgmr.msra.gmra.mrb[0].mxu0 %v261_v17  ;;  %433 = vmatmul.mubr.bf16.vlgmr.msra.gmra.mrb[0].mxu1 %v399_v18 }
 0x16d   : > { %v392_v19 = vpop.f32.mrb[0].mxu0  ;;  %v434_v20 = vpop.f32.mrb[0].mxu1 }
 0x16e   : > { %v441_v21 = vmul.f32 %v392_v19, %v392_v19  ;;  %v445_v22 = vmul.f32 %v434_v20, %v434_v20  ;;  %v394_v23 = vpop.f32.mrb[1].mxu0  ;;  %v436_v24 = vpop.f32.mrb[1].mxu1 }
 0x16f   : > { %v442_v25 = vmul.f32 %v394_v23, %v394_v23  ;;  %v446_v26 = vmul.f32 %v436_v24, %v436_v24  ;;  %v438_v27 = vpop.f32.mrb[2].mxu1  ;;  %v396_v28 = vpop.f32.mrb[2].mxu0 }
 0x170   : > { %v439_v29 = vpop.f32.mrb[3].mxu1  ;;  %v397_v30 = vpop.f32.mrb[3].mxu0 }
 0x171   : > { %v443_v31 = vadd.f32 %v442_v25, %v441_v21  ;;  %v447_v32 = vadd.f32 %v446_v26, %v445_v22 }
 0x173   : > { %v444_v33 = vmax.f32 %v443_v31, 1.1920929e-07  ;;  %v448_v34 = vmax.f32 %v447_v32, 1.1920929e-07 }
 0x175   : > { %493 = vadd.xlane.f32.xlu1 %v444_v33  ;;  %793 = vrcp.f32 %v448_v34  ;;  %vm468_vm0 = vcmp.eq.f32.partialorder %v444_v33, inf  ;;  %v471_v40 = vand.u32 2147483648, %v444_v33  ;;  %vm470_vm1 = vcmp.eq.f32.partialorder %v444_v33, 0.0 }
 0x176   : > { %795 = vrsqrt.f32 %v444_v33  ;;  %vm475_vm2 = vcmp.eq.f32.partialorder %v448_v34, inf  ;;  %v478_v43 = vand.u32 2147483648, %v448_v34  ;;  %vm477_vm3 = vcmp.eq.f32.partialorder %v448_v34, 0.0 }
 0x177   : > { %797 = vrsqrt.f32 %v448_v34 }
 0x17f   : > { %v794_v35 = vpop.eup %793 }
 0x180   : > { %v796_v36 = vpop.eup %795  ;;  %v450_v37 = vmul.f32 %v794_v35, %v444_v33 }
 0x181   : > { %v798_v38 = vpop.eup %797  ;;  %v467_v39 = vmul.f32 %v796_v36, %v444_v33 }
 0x182   : > { %799 = vlog2.f32 %v450_v37  ;;  %v474_v41 = vmul.f32 %v798_v38, %v448_v34 }
 0x183   : > { %v469_v42 = vsel %vm468_vm0, %v444_v33, %v467_v39 }
 0x184   : > { %v472_v44 = vsel %vm470_vm1, %v471_v40, %v469_v42  ;;  %v476_v45 = vsel %vm475_vm2, %v448_v34, %v474_v41 }
 0x185   : > { %v479_v46 = vsel %vm477_vm3, %v478_v43, %v476_v45 }
 0x186   : > { %v480_v47 = vsub.f32 %v472_v44, %v479_v46 }
 0x188   : > { %v481_v51 = vmul.f32 %v480_v47, %v480_v47 }
 0x18c   : > { %v800_v48 = vpop.eup %799 }
 0x18d   : > { %v452_v49 = vmul.f32 0.6931472, %v800_v48 }
 0x18f   : > { %v453_v50 = vand.u32 2147483647, %v452_v49 }
 0x191   : > { %454 = vadd.xlane.f32.xlu0 %v453_v50 }
 0x195   : > { %482 = vadd.xlane.f32.xlu0 %v481_v51 }
 0x202   : > { %v494_v52 = vpop.xlane.xlu1 %493 }
 0x203   : > { %v495_v53 = vrot.slane %v494_v52, 4 }
 0x205   : > { %v496_v54 = vadd.f32 %v495_v53, %v494_v52 }
 0x207   : > { %v497_v58 = vrot.slane %v496_v54, 2 }
 0x209   : > { %v498_v0 = vadd.f32 %v497_v58, %v496_v54 }
 0x20b   : > { %v499_v5 = vrot.slane %v498_v0, 1 }
 0x20d   : > { %v500_v8 = vadd.f32 %v499_v5, %v498_v0 }
 0x21e   : > { %v455_v55 = vpop.xlane.xlu0 %454 }
 0x21f   : > { %v456_v56 = vrot.slane %v455_v55, 4 }
 0x221   : > { %v457_v57 = vadd.f32 %v456_v56, %v455_v55 }
 0x222   : > { %v483_v59 = vpop.xlane.xlu0 %482 }
 0x223   : > { %v458_v60 = vrot.slane %v457_v57, 2  ;;  %v484_v61 = vrot.slane %v483_v59, 4 }
 0x225   : > { %v485_v62 = vadd.f32 %v484_v61, %v483_v59  ;;  %v459_v63 = vadd.f32 %v458_v60, %v457_v57 }
 0x227   : > { %v486_v1 = vrot.slane %v485_v62, 2  ;;  %v460_v2 = vrot.slane %v459_v63, 1 }
 0x229   : > { %v487_v3 = vadd.f32 %v486_v1, %v485_v62  ;;  %v461_v4 = vadd.f32 %v460_v2, %v459_v63 }
 0x22b   : > { %682 = vpush %v461_v4  ;;  %v488_v6 = vrot.slane %v487_v3, 1 }
 0x22d   : > { %v489_v7 = vadd.f32 %v488_v6, %v487_v3 }
 0x22f   : > { %684 = vpush %v489_v7 }
 0x230   : > { %686 = vpush %v500_v8 }
 0x25c   : > { %s683_s18 = spop %682 }
 0x25d   : > { %v463_v11 = vstv %s683_s18 }
 0x25e   : > { %v464_v12 = vmul.f32 0.5, %v463_v11 }
 0x260   : > { %s685_s5 = spop %684  ;;  %v508_v14 = vsel %vm507_vm4, %v464_v12, 0.0 }
 0x261   : > { %v491_v13 = vstv %s685_s5  ;;  %s687_s23 = spop %686 }
 0x262   : > { %v510_v15 = vsel %vm509_vm5, %v491_v13, 0.0  ;;  %v502_v16 = vstv %s687_s23 }
 0x263   : > { %v511_v17 = vadd.f32 %v510_v15, %v508_v14  ;;  %v513_v18 = vsel %vm512_vm6, %v502_v16, 0.0 }
 0x265   : > { %v514_v19 = vadd.f32 %v513_v18, %v511_v17 }
 0x267   : > { %521 = vst [vmem:[%s254_s30] sm:$0xff] %v514_v19 }
 0x268   : > { %902 = shalt.err (!%p899_p4)
}
 0x269   : > { %s903_s4 = scalar_lea.hbm %s1212_s6, 128  ;;  %s907_s22 = scalar_lea.hbm %s1264_s3, 256 }
 0x26a   : > { %p904_p8 = scmp.ne.s32.totalorder %s1212_s6, %s903_s4  ;;  %p908_p10 = scmp.lt.u32.totalorder %s1212_s6, %s1264_s3 }
 0x26b   : > { %p909_p13 = scmp.lt.u32.totalorder %s907_s22, %s903_s4  ;;  %p911_p12 = scmp.lt.u32.totalorder %s903_s4, %s1212_s6 }
 0x26c   : > { %p905_p11 = pnand %p904_p8, %p1285_p0 }
 0x26d   : > { %p910_p3 = por %p909_p13, %p908_p10 }
 0x26e   : > { %p906_p6 = pneg %p905_p11 }
 0x26f   : > { %p912_p5 = por %p911_p12, %p910_p3 }
 0x271   : > { %p913_p9 = pnand %p912_p5, %p906_p6 }
 0x273   : > { %916 = shalt.err (!%p913_p9)
}
 0x274   : > { %696 = dma.vmem_to_hbm [thread:$0]  (%p1285_p0), %s1214_s11, 128, %s1212_s6, %s523_s8  }
 0x275 PF: > { %s548_s20 = sand.u32 1, %s959_s12   ;;  %p1286_p1 = scmp.ne.s32.totalorder %s1272_s21, 0 }
 0x276   : > { %p1287_p2 = scmp.ge.s32.totalorder %s979_s17, 2  ;;  %s549_s5 = scalar_lea.sflag [#allocation5], %s548_s20 }
 0x278   : > { %p710_p7 = pnand %p1287_p2, %p1286_p1 }
 0x27a   : > { %954 = dma.done.wait (!%p710_p7), %s549_s5, 128  }
 0x27b   : > { %956 = vsyncadd (!%p710_p7), %s549_s5, 4294967168  ;;  %s22_s17 = sadd.s32 1, %s979_s17   ;;  %s1288_s25 = sld [smem:[#allocation14_spill]] }
 0x27c   : > { %p19_p4 = scmp.ge.s32.totalorder %s22_s17, 4   ;;  %s1289_s12 = smov %s963_s13 }
 0x27d   : > { %s1290_s13 = smov %s967_s14  ;;  %s1291_s14 = smov %s1111_s29 }
 0x27e   : > { %s1292_s15 = smov %s975_s16  ;;  %21 = sbr.rel (!%p19_p4) target bundleno = 10 (0xa), region = 102 }
 0x281   : > { %s1293_s16 = smov %s1288_s25 }
 0x285   :  { %554 = vsyncpa [#allocation4], 1 }
 0x286   :  { %556 = vsyncpa [#allocation4 + $0x1], 1 }
 0x287   :  { %557 = vsyncpa [#allocation7], 1 }
 0x288   :  { %559 = vsyncpa [#allocation7 + $0x1], 1 }
 0x289   :  { %560 = vsyncpa [#allocation5], 1 }
 0x28a   :  { %562 = vsyncpa [#allocation5 + $0x1], 1 }

</bundles_post_ra>
